<compile_context>
chip_gen: v7x
topology: tpu7x:2x2x1
jax: 0.10.0
libtpu: 0.0.40
codegen_flags: <defaults>
</compile_context>

<pallas_src>
import jax
import jax.numpy as jnp
from jax.experimental import pallas as pl
from jax.experimental.pallas import tpu as pltpu


def _round_up(x, m):
    return (x + m - 1) // m * m


def make_wordcnn_kernel(*, B, L_pad, E, V, max_ks, l_out_pad, n_pad, bias_rows):
    """Fused gather / im2col-conv / tanh / max-over-time / linear kernel body."""

    def kernel(ids_ref, table_ref, w_ref, bm_ref, lwb_ref, out_ref):
        # --- embedding gather as one-hot matmul (MXU); -1 ids -> zero rows ---
        ids = ids_ref[...]                                         # (B*L_pad, 1) i32
        onehot = (ids == jax.lax.broadcasted_iota(
            jnp.int32, (B * L_pad, V), 1)).astype(jnp.float32)     # (B*L_pad, V)
        emb = jnp.dot(onehot, table_ref[...],
                      preferred_element_type=jnp.float32)          # (B*L_pad, E)
        emb = emb.reshape(B, L_pad, E)

        # --- im2col over taps: one patch matrix, one fused conv matmul ---
        patches = jnp.concatenate(
            [emb[:, j:j + l_out_pad, :] for j in range(max_ks)], axis=-1)
        patches = patches.reshape(B * l_out_pad, max_ks * E)       # (B*lp, ks*E)
        z = jnp.dot(patches, w_ref[...],
                    preferred_element_type=jnp.float32)            # (B*lp, n_pad)

        bias = bm_ref[0:1, :]                                      # (1, n_pad)
        mask = bm_ref[bias_rows:bias_rows + l_out_pad, :]          # (lp, n_pad)
        fmap = jnp.tanh(z + bias).reshape(B, l_out_pad, n_pad) + mask[None, :, :]
        pooled = jnp.max(fmap, axis=1)                             # (B, n_pad)

        # --- final linear (dropout is identity in eval mode) ---
        # TODO(synk): train-mode dropout masking (pltpu.prng_random_bits) not applied.
        lin_w = lwb_ref[0:n_pad, :]                                # (n_pad, c_pad)
        lin_b = lwb_ref[n_pad:n_pad + 1, :]                        # (1, c_pad)
        logits = jnp.dot(pooled, lin_w,
                         preferred_element_type=jnp.float32) + lin_b
        out_ref[...] = logits.astype(out_ref.dtype)

    return kernel


def word_cnn_forward(x_tokens, params, *, kernel_size_list, kernel_num,
                     class_num):
    """Full WordCNN forward. x_tokens: (B, L) int32 token ids."""
    emb_table = params["embedding"].astype(jnp.float32)            # (V, E)
    V, E = emb_table.shape
    B, L = x_tokens.shape
    K = kernel_num
    n_feat = K * len(kernel_size_list)
    max_ks = max(kernel_size_list)
    min_ks = min(kernel_size_list)

    l_out_pad = _round_up(L - min_ks + 1, 8)      # padded max-over-time length
    L_pad = _round_up(l_out_pad + max_ks - 1, 8)  # padded gathered seq length
    n_pad = _round_up(max(n_feat, 128), 128)      # lane-dense conv channels
    c_pad = _round_up(max(class_num, 128), 128)   # lane-dense logits
    bias_rows = 8                                 # sublane-aligned bias block

    # ---- pack fused conv weight / bias / position mask (wrapper glue) ----
    w_fused = jnp.zeros((max_ks * E, n_pad), jnp.float32)
    bias = jnp.zeros((bias_rows, n_pad), jnp.float32)
    mask = jnp.zeros((l_out_pad, n_pad), jnp.float32)
    pos = jnp.arange(l_out_pad)
    for i, ks in enumerate(kernel_size_list):
        w = params[f"conv{i}_w"].astype(jnp.float32)               # (K, E, ks)
        b = params[f"conv{i}_b"].astype(jnp.float32)               # (K,)
        w_t = jnp.transpose(w, (2, 1, 0))                          # (ks, E, K)
        w_t = jnp.pad(w_t, ((0, max_ks - ks), (0, 0), (0, 0)))     # zero taps
        w_fused = w_fused.at[:, i * K:(i + 1) * K].set(
            w_t.reshape(max_ks * E, K))
        bias = bias.at[0, i * K:(i + 1) * K].set(b)
        col_mask = jnp.where(pos < (L - ks + 1), 0.0, -1e30).astype(jnp.float32)
        mask = mask.at[:, i * K:(i + 1) * K].set(
            jnp.broadcast_to(col_mask[:, None], (l_out_pad, K)))
    bias_mask = jnp.concatenate([bias, mask], axis=0)              # (8+lp, n_pad)

    # ---- pack pre-transposed linear weight + bias ----
    lin_w = jnp.zeros((n_pad, c_pad), jnp.float32)
    lin_w = lin_w.at[:n_feat, :class_num].set(
        params["linear_w"].astype(jnp.float32).T)
    lin_b = jnp.zeros((1, c_pad), jnp.float32)
    lin_b = lin_b.at[0, :class_num].set(params["linear_b"].astype(jnp.float32))
    lin_wb = jnp.concatenate([lin_w, lin_b], axis=0)               # (n_pad+1, c_pad)

    # ---- token ids: pad with -1 sentinels (gather to zero rows in-kernel) ----
    ids = jnp.pad(x_tokens.astype(jnp.int32), ((0, 0), (0, L_pad - L)),
                  constant_values=-1).reshape(B * L_pad, 1)

    kernel = make_wordcnn_kernel(B=B, L_pad=L_pad, E=E, V=V, max_ks=max_ks,
                                 l_out_pad=l_out_pad, n_pad=n_pad,
                                 bias_rows=bias_rows)

    inputs = (ids, emb_table, w_fused, bias_mask, lin_wb)
    flops = (2 * B * L_pad * V * E
             + 2 * B * l_out_pad * (max_ks * E) * n_pad
             + 2 * B * n_pad * c_pad)
    bytes_accessed = (sum(int(a.size) * a.dtype.itemsize for a in inputs)
                      + B * c_pad * 4)
    cost = pl.CostEstimate(flops=flops,
                           transcendentals=B * l_out_pad * n_pad,
                           bytes_accessed=bytes_accessed)

    vmem = pl.BlockSpec(memory_space=pltpu.MemorySpace.VMEM)
    # No grid: the whole problem is tiny and VMEM-resident. For large batch,
    # add a grid over B marked "parallel" (to use both v7x TensorCores) and
    # re-derive the batch tile against v7x's 64 MiB VMEM budget.
    out_padded = pl.pallas_call(
        kernel,
        out_shape=jax.ShapeDtypeStruct((B, c_pad), jnp.float32),
        in_specs=[vmem] * len(inputs),
        out_specs=vmem,
        cost_estimate=cost,
    )(*inputs)
    return out_padded[:, :class_num]


def reference_forward(x_tokens, params, *, kernel_size_list, kernel_num,
                      class_num):
    """Pure-JAX reference (mirrors the PyTorch forward, eval mode)."""
    embed = jnp.take(params["embedding"], x_tokens, axis=0)        # (B, L, E)
    B, L, E = embed.shape
    feats = []
    for i, ks in enumerate(kernel_size_list):
        w = params[f"conv{i}_w"]     # (K, E, ks)
        b = params[f"conv{i}_b"]     # (K,)
        l_out = L - ks + 1
        acc = jnp.zeros((B, l_out, kernel_num), jnp.float32)
        for j in range(ks):
            acc = acc + jnp.einsum("ble,ke->blk",
                                   embed[:, j:j + l_out, :], w[:, :, j])
        fmap = jnp.tanh(acc + b[None, None, :])
        feats.append(jnp.max(fmap, axis=1))
    features = jnp.concatenate(feats, axis=1)
    return features @ params["linear_w"].T + params["linear_b"]


if __name__ == "__main__":
    # --- hyperparameters (args analogue) ---
    vocab_size = 50
    embed_dim = 32
    kernel_num = 8
    kernel_size_list = [3, 4, 5]     # args.kernel_sizes = "3,4,5"
    class_num = 4
    batch, seq_len = 2, 16
    total_filters = kernel_num * len(kernel_size_list)

    # --- deterministic parameter init ---
    key = jax.random.PRNGKey(0)
    keys = jax.random.split(key, 4 + 2 * len(kernel_size_list))
    params = {
        "embedding": jax.random.normal(keys[0], (vocab_size, embed_dim),
                                       jnp.float32),
        "linear_w": 0.1 * jax.random.normal(keys[1],
                                            (class_num, total_filters),
                                            jnp.float32),
        "linear_b": 0.1 * jax.random.normal(keys[2], (class_num,),
                                            jnp.float32),
    }
    for i, ks in enumerate(kernel_size_list):
        params[f"conv{i}_w"] = 0.1 * jax.random.normal(
            keys[3 + 2 * i], (kernel_num, embed_dim, ks), jnp.float32)
        params[f"conv{i}_b"] = 0.1 * jax.random.normal(
            keys[4 + 2 * i], (kernel_num,), jnp.float32)

    # --- deterministic input token ids ---
    x = jax.random.randint(keys[-1], (batch, seq_len), 0, vocab_size,
                           dtype=jnp.int32)

    out = word_cnn_forward(x, params,
                           kernel_size_list=kernel_size_list,
                           kernel_num=kernel_num, class_num=class_num)
    out = jax.block_until_ready(out)

    ref = reference_forward(x, params,
                            kernel_size_list=kernel_size_list,
                            kernel_num=kernel_num, class_num=class_num)
    assert out.shape == (batch, class_num)
    assert jnp.allclose(out, ref, atol=1e-4, rtol=1e-4), "mismatch vs reference"
    print("KERNEL_OK")
</pallas_src>

<mosaic_0001>
module attributes {stable_mosaic.version = 11 : i64} {
  func.func @kernel(%arg0: memref<48x1xi32, #tpu.memory_space<vmem>>, %arg1: memref<50x32xf32, #tpu.memory_space<vmem>>, %arg2: memref<160x128xf32, #tpu.memory_space<vmem>>, %arg3: memref<24x128xf32, #tpu.memory_space<vmem>>, %arg4: memref<129x128xf32, #tpu.memory_space<vmem>>, %arg5: memref<2x128xf32, #tpu.memory_space<vmem>>) attributes {dimension_semantics = [], scalar_prefetch = 0 : i64, scratch_operands = 0 : i64, tpu.core_type = #tpu.core_type<tc>} {
    %c0 = arith.constant 0 : index
    %c0_0 = arith.constant 0 : index
    %0 = vector.load %arg0[%c0, %c0_0] : memref<48x1xi32, #tpu.memory_space<vmem>>, vector<48x1xi32>
    %1 = tpu.iota {dimensions = array<i32: 1>} : vector<48x50xi32>
    %2 = vector.broadcast %0 : vector<48x1xi32> to vector<48x50xi32>
    %3 = arith.cmpi eq, %2, %1 : vector<48x50xi32>
    %4 = arith.extui %3 : vector<48x50xi1> to vector<48x50xi32>
    %5 = arith.sitofp %4 : vector<48x50xi32> to vector<48x50xf32>
    %c0_1 = arith.constant 0 : index
    %c0_2 = arith.constant 0 : index
    %6 = vector.load %arg1[%c0_1, %c0_2] : memref<50x32xf32, #tpu.memory_space<vmem>>, vector<50x32xf32>
    %cst = arith.constant dense<0.000000e+00> : vector<48x32xf32>
    %7 = tpu.matmul %5, %6, %cst {dimension_numbers = #tpu.dot_dimension_numbers<[1], [0], [0], [1], [0, 0, 1, 1], [], []>} : vector<48x50xf32>, vector<50x32xf32>, vector<48x32xf32> -> vector<48x32xf32>
    %8 = vector.shape_cast %7 : vector<48x32xf32> to vector<2x24x32xf32>
    %9 = vector.extract_strided_slice %8 {offsets = [0, 0, 0], sizes = [2, 16, 32], strides = [1, 1, 1]} : vector<2x24x32xf32> to vector<2x16x32xf32>
    %10 = vector.extract_strided_slice %8 {offsets = [0, 1, 0], sizes = [2, 16, 32], strides = [1, 1, 1]} : vector<2x24x32xf32> to vector<2x16x32xf32>
    %11 = vector.extract_strided_slice %8 {offsets = [0, 2, 0], sizes = [2, 16, 32], strides = [1, 1, 1]} : vector<2x24x32xf32> to vector<2x16x32xf32>
    %12 = vector.extract_strided_slice %8 {offsets = [0, 3, 0], sizes = [2, 16, 32], strides = [1, 1, 1]} : vector<2x24x32xf32> to vector<2x16x32xf32>
    %13 = vector.extract_strided_slice %8 {offsets = [0, 4, 0], sizes = [2, 16, 32], strides = [1, 1, 1]} : vector<2x24x32xf32> to vector<2x16x32xf32>
    %14 = tpu.concatenate %9, %10, %11, %12, %13 in 2 : vector<2x16x32xf32>, vector<2x16x32xf32>, vector<2x16x32xf32>, vector<2x16x32xf32>, vector<2x16x32xf32> -> vector<2x16x160xf32>
    %15 = vector.shape_cast %14 : vector<2x16x160xf32> to vector<32x160xf32>
    %c0_3 = arith.constant 0 : index
    %c0_4 = arith.constant 0 : index
    %16 = vector.load %arg2[%c0_3, %c0_4] : memref<160x128xf32, #tpu.memory_space<vmem>>, vector<160x128xf32>
    %cst_5 = arith.constant dense<0.000000e+00> : vector<32x128xf32>
    %17 = tpu.matmul %15, %16, %cst_5 {dimension_numbers = #tpu.dot_dimension_numbers<[1], [0], [0], [1], [0, 0, 1, 1], [], []>} : vector<32x160xf32>, vector<160x128xf32>, vector<32x128xf32> -> vector<32x128xf32>
    %c0_6 = arith.constant 0 : index
    %c0_7 = arith.constant 0 : index
    %18 = vector.load %arg3[%c0_6, %c0_7] : memref<24x128xf32, #tpu.memory_space<vmem>>, vector<1x128xf32>
    %c8 = arith.constant 8 : index
    %c0_8 = arith.constant 0 : index
    %19 = vector.load %arg3[%c8, %c0_8] : memref<24x128xf32, #tpu.memory_space<vmem>>, vector<16x128xf32>
    %20 = vector.broadcast %18 : vector<1x128xf32> to vector<32x128xf32>
    %21 = arith.addf %17, %20 : vector<32x128xf32>
    %22 = math.tanh %21 : vector<32x128xf32>
    %23 = vector.shape_cast %22 : vector<32x128xf32> to vector<2x16x128xf32>
    %24 = vector.shape_cast %19 : vector<16x128xf32> to vector<1x16x128xf32>
    %25 = vector.broadcast %24 : vector<1x16x128xf32> to vector<2x16x128xf32>
    %26 = arith.addf %23, %25 : vector<2x16x128xf32>
    %cst_9 = arith.constant dense<0xFF800000> : vector<2x128xf32>
    %27 = vector.multi_reduction <maximumf>, %26, %cst_9 [1] : vector<2x16x128xf32> to vector<2x128xf32>
    %c0_10 = arith.constant 0 : index
    %c0_11 = arith.constant 0 : index
    %28 = vector.load %arg4[%c0_10, %c0_11] : memref<129x128xf32, #tpu.memory_space<vmem>>, vector<128x128xf32>
    %c128 = arith.constant 128 : index
    %c0_12 = arith.constant 0 : index
    %29 = vector.load %arg4[%c128, %c0_12] : memref<129x128xf32, #tpu.memory_space<vmem>>, vector<1x128xf32>
    %cst_13 = arith.constant dense<0.000000e+00> : vector<2x128xf32>
    %30 = tpu.matmul %27, %28, %cst_13 {dimension_numbers = #tpu.dot_dimension_numbers<[1], [0], [0], [1], [0, 0, 1, 1], [], []>} : vector<2x128xf32>, vector<128x128xf32>, vector<2x128xf32> -> vector<2x128xf32>
    %31 = vector.broadcast %29 : vector<1x128xf32> to vector<2x128xf32>
    %32 = arith.addf %30, %31 : vector<2x128xf32>
    %c0_14 = arith.constant 0 : index
    %c0_15 = arith.constant 0 : index
    %33 = vector.load %arg5[%c0_14, %c0_15] : memref<2x128xf32, #tpu.memory_space<vmem>>, vector<2x128xf32>
    tpu.vector_store %arg5[%c0_14, %c0_15], %32 {strides = array<i32>} : memref<2x128xf32, #tpu.memory_space<vmem>>, vector<2x128xf32>,
    return
  }
}

</mosaic_0001>

<bundles_post_ra>
// kernel: tpu_custom_call.1
= control target key start
LH: loop header
LB: loop body
LE: loop exit
PB: predicated region body
PF: predicated region fallthrough
CT: control target
= control target key end

     0   :  { %10 = vsyncpa [#allocation3], 0  ;;  %s1108_s0 = inlined_call_operand.vmem [shape: s32[48,1], index: 0, kind: input, shape index: {}]   ;;  %s1109_s1 = inlined_call_operand.vmem [shape: f32[50,32], index: 1, kind: input, shape index: {}]   ;;  %s1110_s2 = inlined_call_operand.hbm [shape: f32[160,128], index: 2, kind: input, shape index: {}]   ;;  %s1111_s3 = inlined_call_operand.hbm [shape: f32[24,128], index: 3, kind: input, shape index: {}]   ;;  %s1112_s4 = inlined_call_operand.vmem [shape: f32[129,128], index: 4, kind: input, shape index: {}]   ;;  %s1113_s5 = inlined_call_operand.hbm [shape: f32[2,128], index: 5, kind: output, shape index: {}]  }
   0x1   :  { %11 = vsyncpa [#allocation6], 0 }
   0x2   :  { %12 = vsyncpa [#allocation4], 0  ;;  %s856_s18 = smov [#allocation2]   ;;  %s784_s22 = scalar_lea.hbm %s1110_s2, 2560 }
   0x3   :  { %s22_s19 = sshll.u32 %s856_s18, 4  ;;  %p785_p0 = scmp.ne.s32.totalorder %s1110_s2, %s784_s22  ;;  %s23_s19 = int_to_ptr.vmem [resolvable:$true] %s22_s19 }
   0x4   :  { %p788_p1 = scmp.lt.u32.totalorder %s784_s22, %s1110_s2 }
   0x6   :  { %p790_p2 = pnand %p788_p1, %p785_p0 }
   0x8   :  { %793 = shalt.err (!%p790_p2)
}
   0x9   :  { %s794_s27 = scalar_lea.vmem %s23_s19, 2560  ;;  %p799_p4 = scmp.lt.s32.totalorder %s23_s19, %s23_s19 }
   0xa   :  { %p795_p3 = scmp.ne.s32.totalorder %s23_s19, %s794_s27  ;;  %p800_p5 = scmp.lt.s32.totalorder %s794_s27, %s794_s27 }
   0xc   :  { %p801_p6 = por %p800_p5, %p799_p4 }
   0xe   :  { %p802_p7 = pnand %p801_p6, %p795_p3 }
  0x10   :  { %805 = shalt.err (!%p802_p7)
}
  0x11   :  { %s857_s28 = smov 128   ;;  %s858_s29 = smov 8  }
  0x12   :  { %28 = dma.hbm_to_vmem [thread:$0]  %s1110_s2, 2560, %s23_s19, [#allocation3], %s857_s28, %s857_s28, %s858_s29  }
  0x13   :  { %s859_s7 = smov [#allocation5]   ;;  %s806_s11 = scalar_lea.hbm %s1111_s3, 384 }
  0x14   :  { %s34_s8 = sshll.u32 %s859_s7, 4  ;;  %p807_p8 = scmp.ne.s32.totalorder %s1111_s3, %s806_s11  ;;  %s35_s8 = int_to_ptr.vmem [resolvable:$true] %s34_s8 }
  0x15   :  { %p810_p9 = scmp.lt.u32.totalorder %s806_s11, %s1111_s3 }
  0x17   :  { %p812_p10 = pnand %p810_p9, %p807_p8 }
  0x19   :  { %815 = shalt.err (!%p812_p10)
}
  0x1a   :  { %s816_s16 = scalar_lea.vmem %s35_s8, 384  ;;  %p821_p12 = scmp.lt.s32.totalorder %s35_s8, %s35_s8 }
  0x1b   :  { %p817_p11 = scmp.ne.s32.totalorder %s35_s8, %s816_s16  ;;  %p822_p13 = scmp.lt.s32.totalorder %s816_s16, %s816_s16 }
  0x1d   :  { %p823_p0 = por %p822_p13, %p821_p12 }
  0x1f   :  { %p824_p1 = pnand %p823_p0, %p817_p11 }
  0x21   :  { %827 = shalt.err (!%p824_p1)
}
  0x22   :  { %40 = dma.hbm_to_vmem [thread:$0]  %s1111_s3, 384, %s35_s8, [#allocation6], %s857_s28, %s857_s28, %s858_s29  }
  0x23   :  { %850 = dma.done.wait [#allocation3], 2560  }
  0x24   :  { %851 = vsyncadd [#allocation3], 4294964736 }
  0x25   :  { %852 = dma.done.wait [#allocation6], 384  }
  0x26   :  { %853 = vsyncadd [#allocation6], 4294966912  ;;  %v860_v0 = vmov 0   ;;  %v51_v1 = vld [vmem:[%s1108_s0 + $0x10] sm:$0xff]  ;;  %v49_v2 = vld [vmem:[%s1108_s0] sm:$0xff]  ;;  %vm119_vm0 = vcmask 1041408   ;;  %v55_v17 = vlaneseq }
  0x27   :  { %760 = vset.pattern.permute.xlu1 %v860_v0  ;;  %759 = vset.pattern.permute.xlu0 %v860_v0  ;;  %v52_v3 = vld [vmem:[%s1108_s0 + $0x18] sm:$0xff]  ;;  %v50_v4 = vld [vmem:[%s1108_s0 + $0x8] sm:$0xff]  ;;  %v93_v5 = vld [vmem:[%s1109_s1] sm:$0xff]  ;;  %vm100_vm1 = vcmask 408576   ;;  %v861_v21 = vmov 0.0   ;;  %v862_v35 = vmov 0.0|0.0  }
  0x28   :  { %64 = vperm.xlu1 %760, %v51_v1   ;;  %58 = vperm.xlu0 %759, %v49_v2   ;;  %v94_v6 = vld [vmem:[%s1109_s1 + $0x8] sm:$0xff]  ;;  %v95_v7 = vld [vmem:[%s1109_s1 + $0x10] sm:$0xff]  ;;  %v96_v9 = vld [vmem:[%s1109_s1 + $0x18] sm:$0xff]  ;;  %v56_v18 = vand.u32 127, %v55_v17  ;;  %vm293_vm8 = vcmask 1043456   ;;  %vm247_vm9 = vcmask 1045504  }
  0x29   :  { %v681_v8 = vpack.c.bf16 %v94_v6, %v93_v5  ;;  %v685_v10 = vpack.c.bf16 %v96_v9, %v95_v7  ;;  %v97_v11 = vld [vmem:[%s1109_s1 + $0x20] sm:$0xff]  ;;  %v98_v12 = vld [vmem:[%s1109_s1 + $0x28] sm:$0xff]  ;;  %v99_v16 = vld [vmem:[%s1109_s1 + $0x30] sm:$0x3]  ;;  %693 = vmatprep.subr.bf16.mxu1 %v862_v35  ;;  %vm304_vm10 = vcmask 261120   ;;  %vm224_vm11 = vcmask 1046528  }
  0x2a   :  { %v54_v13 = vld [vmem:[%s1108_s0 + $0x28] sm:$0xff]  ;;  %v53_v14 = vld [vmem:[%s1108_s0 + $0x20] sm:$0xff]  ;;  %v689_v15 = vpack.c.bf16 %v98_v12, %v97_v11  ;;  %v319_v32 = vld [vmem:[#allocation2] sm:$0xff]  ;;  %vm270_vm12 = vcmask 1044480   ;;  %s863_s0 = smov 64   ;;  %s864_s1 = smov 32  }
  0x2b   :  { %682 = vmatprep.subr.bf16.mxu0 %v681_v8  ;;  %v320_v33 = vld [vmem:[#allocation2 + $0x8] sm:$0xff]  ;;  %v321_v34 = vld [vmem:[#allocation2 + $0x10] sm:$0xff]  ;;  %v322_v37 = vld [vmem:[#allocation2 + $0x18] sm:$0xff]  ;;  %s865_s17 = smov 96   ;;  %vm309_vm13 = vcmask 523264   ;;  %vm314_vm14 = vcmask 785408  }
  0x2c   :  { %67 = vperm.xlu1 %760, %v52_v3   ;;  %61 = vperm.xlu0 %759, %v50_v4   ;;  %v694_v36 = vpack.c.bf16 %v320_v33, %v319_v32  ;;  %v697_v38 = vpack.c.bf16 %v322_v37, %v321_v34  ;;  %v323_v39 = vld [vmem:[#allocation2 + $0x20] sm:$0xff]  ;;  %v324_v40 = vld [vmem:[#allocation2 + $0x28] sm:$0xff]  ;;  %v325_v42 = vld [vmem:[#allocation2 + $0x30] sm:$0xff]  ;;  %vm866_vm15 = vmmov 0   ;;  %s867_s23 = smov [#allocation7]  }
  0x2d   :  { %684 = vmatpush3.bf16.msra.mxu0 %v681_v8  ;;  %v700_v41 = vpack.c.bf16 %v324_v40, %v323_v39  ;;  %v326_v43 = vld [vmem:[#allocation2 + $0x38] sm:$0xff]  ;;  %v327_v45 = vld [vmem:[#allocation2 + $0x40] sm:$0xff]  ;;  %v328_v46 = vld [vmem:[#allocation2 + $0x48] sm:$0xff]  ;;  %s564_s3 = sshll.u32 %s867_s23, 4  ;;  %s565_s3 = int_to_ptr.vmem [resolvable:$true] %s564_s3 }
  0x2e   :  { %686 = vmatprep.subr.bf16.mxu0 %v685_v10  ;;  %695 = vmatpush1.bf16.msra.mxu1 %v694_v36  ;;  %v703_v44 = vpack.c.bf16 %v326_v43, %v325_v42  ;;  %v706_v47 = vpack.c.bf16 %v328_v46, %v327_v45  ;;  %v329_v48 = vld [vmem:[#allocation2 + $0x50] sm:$0xff]  ;;  %v330_v49 = vld [vmem:[#allocation2 + $0x58] sm:$0xff]  ;;  %v331_v51 = vld [vmem:[#allocation2 + $0x60] sm:$0xff]  ;;  %s828_s24 = scalar_lea.vmem %s565_s3, 32  ;;  %p833_p3 = scmp.lt.s32.totalorder %s565_s3, %s565_s3 }
  0x2f   :  { %696 = vmatprep.subr.bf16.mxu1 %v862_v35  ;;  %v709_v50 = vpack.c.bf16 %v330_v49, %v329_v48  ;;  %v332_v52 = vld [vmem:[#allocation2 + $0x68] sm:$0xff]  ;;  %v333_v54 = vld [vmem:[#allocation2 + $0x70] sm:$0xff]  ;;  %v334_v55 = vld [vmem:[#allocation2 + $0x78] sm:$0xff]  ;;  %p829_p2 = scmp.ne.s32.totalorder %s565_s3, %s828_s24  ;;  %p834_p4 = scmp.lt.s32.totalorder %s828_s24, %s828_s24 }
  0x30   :  { %73 = vperm.xlu1 %760, %v54_v13   ;;  %70 = vperm.xlu0 %759, %v53_v14   ;;  %v712_v53 = vpack.c.bf16 %v332_v52, %v331_v51  ;;  %v715_v56 = vpack.c.bf16 %v334_v55, %v333_v54  ;;  %v335_v57 = vld [vmem:[#allocation2 + $0x80] sm:$0xff]  ;;  %v336_v58 = vld [vmem:[#allocation2 + $0x88] sm:$0xff]  ;;  %v337_v61 = vld [vmem:[#allocation2 + $0x90] sm:$0xff] }
  0x31   :  { %688 = vmatpush3.bf16.msra.mxu0 %v685_v10  ;;  %v718_v59 = vpack.c.bf16 %v336_v58, %v335_v57  ;;  %v338_v62 = vld [vmem:[#allocation2 + $0x98] sm:$0xff]  ;;  %p835_p5 = por %p834_p4, %p833_p3 }
  0x32   :  { %690 = vmatprep.subr.bf16.mxu0 %v689_v15  ;;  %698 = vmatpush1.bf16.msra.mxu1 %v697_v38  ;;  %v721_v8 = vpack.c.bf16 %v338_v62, %v337_v61 }
  0x33   :  { %699 = vmatprep.subr.bf16.mxu1 %v862_v35  ;;  %p836_p6 = pnand %p835_p5, %p829_p2 }
  0x35   :  { %692 = vmatpush3.bf16.msra.mxu0 %v689_v15 }
  0x36   :  { %635 = vmatprep.subr.msk.mxu0 %vm119_vm0, %v99_v16  ;;  %701 = vmatpush1.bf16.msra.mxu1 %v700_v41 }
  0x37   :  { %702 = vmatprep.subr.bf16.mxu1 %v862_v35 }
  0x39   :  { %636 = vmatpush3.msk.msra.mxu0 %vm119_vm0, %v99_v16  ;;  %vm484_vm0 = vcmask 1041409  }
  0x3a   :  { %723 = vmatprep.subr.bf16.mxu0 %v862_v35  ;;  %704 = vmatpush1.bf16.msra.mxu1 %v703_v44 }
  0x3b   :  { %705 = vmatprep.subr.bf16.mxu1 %v862_v35 }
  0x3e   :  { %707 = vmatpush1.bf16.msra.mxu1 %v706_v47 }
  0x3f   :  { %708 = vmatprep.subr.bf16.mxu1 %v862_v35 }
  0x42   :  { %710 = vmatpush1.bf16.msra.mxu1 %v709_v50 }
  0x43   :  { %711 = vmatprep.subr.bf16.mxu1 %v862_v35 }
  0x46   :  { %713 = vmatpush1.bf16.msra.mxu1 %v712_v53 }
  0x47   :  { %714 = vmatprep.subr.bf16.mxu1 %v862_v35 }
  0x4a   :  { %716 = vmatpush1.bf16.msra.mxu1 %v715_v56 }
  0x4b   :  { %717 = vmatprep.subr.bf16.mxu1 %v862_v35 }
  0x4e   :  { %719 = vmatpush1.bf16.msra.mxu1 %v718_v59 }
  0x4f   :  { %720 = vmatprep.subr.bf16.mxu1 %v862_v35 }
  0x52   :  { %722 = vmatpush1.bf16.msra.mxu1 %v721_v8 }
  0xa7   :  { %v65_v19 = vpop.permute.xlu1 %64  ;;  %v59_v20 = vpop.permute.xlu0 %58 }
  0xa8   :  { %vm75_vm2 = vcmp.eq.s32.totalorder %v59_v20, %v56_v18  ;;  %vm77_vm3 = vcmp.eq.s32.totalorder %v65_v19, %v56_v18 }
  0xa9   :  { %v574_v22 = vsel %vm75_vm2, 1.0, %v861_v21  ;;  %v576_v25 = vsel %vm77_vm3, 1.0, %v861_v21 }
  0xaa   :  { %637 = vmatprep.mubr.msk.f32.mxu0 %vm100_vm1, %v574_v22 }
  0xab   :  { %v68_v23 = vpop.permute.xlu1 %67  ;;  %v62_v24 = vpop.permute.xlu0 %61 }
  0xac   :  { %vm76_vm4 = vcmp.eq.s32.totalorder %v62_v24, %v56_v18  ;;  %vm78_vm5 = vcmp.eq.s32.totalorder %v68_v23, %v56_v18 }
  0xad   :  { %v575_v26 = vsel %vm76_vm4, 1.0, %v861_v21  ;;  %v577_v29 = vsel %vm78_vm5, 1.0, %v861_v21 }
  0xae   :  { %638 = vmatmul.mubr.msk.f32.vlgmr.msra.gmra.mrb[0].mxu0 %vm100_vm1, %v575_v26 }
  0xaf   :  { %v74_v27 = vpop.permute.xlu1 %73  ;;  %640 = vmatprep.mubr.msk.f32.mxu0 %vm100_vm1, %v576_v25  ;;  %v71_v28 = vpop.permute.xlu0 %70 }
  0xb0   :  { %vm79_vm6 = vcmp.eq.s32.totalorder %v71_v28, %v56_v18  ;;  %vm80_vm7 = vcmp.eq.s32.totalorder %v74_v27, %v56_v18 }
  0xb1   :  { %v578_v30 = vsel %vm79_vm6, 1.0, %v861_v21  ;;  %v579_v31 = vsel %vm80_vm7, 1.0, %v861_v21 }
  0xb2   :  { %641 = vmatmul.mubr.msk.f32.gmra.mrb[2].mxu0 %vm100_vm1, %v577_v29 }
  0xb3   :  { %643 = vmatprep.mubr.msk.f32.mxu0 %vm100_vm1, %v578_v30 }
  0xb6   :  { %644 = vmatmul.mubr.msk.f32.gmra.mrb[4].mxu0 %vm100_vm1, %v579_v31 }
  0xb7   :  { %678 = vmatprep.mubr.msk.f32.mxu0 %vm866_vm15, %v861_v21 }
 0x181   :  { %v983_v60 = vpop.f32.mrb[0].mxu0 }
 0x182   :  { %v226_v63 = vrot.slane %v983_v60, 1  ;;  %v249_v0 = vrot.slane %v983_v60, 2  ;;  %v272_v1 = vrot.slane %v983_v60, 3  ;;  %v989_v2 = vpop.f32.mrb[1].mxu0  ;;  %v295_v3 = vrot.slane %v983_v60, 4 }
 0x183   :  { %v225_v4 = vrot.slane %v989_v2, 1  ;;  %v248_v5 = vrot.slane %v989_v2, 2  ;;  %v271_v6 = vrot.slane %v989_v2, 3  ;;  %v294_v7 = vrot.slane %v989_v2, 4 }
 0x185   :  { %v996_v9 = vpop.f32.mrb[2].mxu0  ;;  %v296_v10 = vsel %vm293_vm8, %v294_v7, %v295_v3  ;;  %v250_v11 = vsel %vm247_vm9, %v248_v5, %v249_v0  ;;  %v227_v12 = vsel %vm224_vm11, %v225_v4, %v226_v63  ;;  %v273_v13 = vsel %vm270_vm12, %v271_v6, %v272_v1 }
 0x186   :  { %v199_v14 = vpop.f32.mrb[3].mxu0  ;;  %588 = vmatprep.mubr.msk.f32.mxu1 %vm304_vm10, %v296_v10  ;;  %v230_v19 = vrot.slane %v996_v9, 1  ;;  %v253_v20 = vrot.slane %v996_v9, 2  ;;  %v276_v38 = vrot.slane %v996_v9, 3  ;;  %v299_v43 = vrot.slane %v996_v9, 4 }
 0x187   :  { %v228_v15 = vrot.slane %v199_v14, 1  ;;  %v251_v16 = vrot.slane %v199_v14, 2  ;;  %v274_v17 = vrot.slane %v199_v14, 3  ;;  %v297_v18 = vrot.slane %v199_v14, 4  ;;  %v462_v14 = vld [vmem:[%s1112_s4 + $0x8] sm:$0xff] }
 0x189   :  { %v645_v22 = vpop.f32.mrb[4].mxu0  ;;  %v252_v23 = vsel %vm247_vm9, %v249_v0, %v251_v16  ;;  %v229_v24 = vsel %vm224_vm11, %v226_v63, %v228_v15  ;;  %v275_v25 = vsel %vm270_vm12, %v272_v1, %v274_v17  ;;  %v298_v26 = vsel %vm293_vm8, %v295_v3, %v297_v18  ;;  %v463_v16 = vld [vmem:[%s1112_s4 + $0x10] sm:$0xff]  ;;  %v464_v17 = vld [vmem:[%s1112_s4 + $0x18] sm:$0xff] }
 0x18a   :  { %v233_v27 = vrot.slane %v645_v22, 1  ;;  %v256_v28 = vrot.slane %v645_v22, 2  ;;  %v279_v29 = vrot.slane %v645_v22, 3  ;;  %v302_v30 = vrot.slane %v645_v22, 4  ;;  %v209_v31 = vpop.f32.mrb[5].mxu0 }
 0x18b   :  { %v766_v32 = vpack.i.bf16 %v252_v23, %v250_v11  ;;  %v761_v33 = vpack.i.bf16 %v229_v24, %v227_v12  ;;  %v771_v34 = vpack.i.bf16 %v275_v25, %v273_v13  ;;  %v231_v36 = vrot.slane %v209_v31, 1  ;;  %v461_v13 = vld [vmem:[%s1112_s4] sm:$0xff]  ;;  %v467_v23 = vld [vmem:[%s1112_s4 + $0x30] sm:$0xff]  ;;  %v468_v24 = vld [vmem:[%s1112_s4 + $0x38] sm:$0xff] }
 0x18c   :  { %v254_v37 = vrot.slane %v209_v31, 2  ;;  %v277_v39 = vrot.slane %v209_v31, 3  ;;  %v300_v40 = vrot.slane %v209_v31, 4  ;;  %v724_v15 = vpack.c.bf16 %v462_v14, %v461_v13 }
 0x18d   :  { %767 = vrot.lane.b32.xlu1 %v766_v32, %s863_s0  ;;  %762 = vrot.lane.b32.xlu0 %v761_v33, %s864_s1  ;;  %v232_v41 = vsel %vm224_vm11, %v230_v19, %v231_v36  ;;  %v234_v42 = vsel %vm224_vm11, %v231_v36, %v233_v27  ;;  %v727_v18 = vpack.c.bf16 %v464_v17, %v463_v16  ;;  %v465_v19 = vld [vmem:[%s1112_s4 + $0x20] sm:$0xff]  ;;  %v470_v27 = vld [vmem:[%s1112_s4 + $0x48] sm:$0xff] }
 0x18e   :  { %v255_v44 = vsel %vm247_vm9, %v253_v20, %v254_v37  ;;  %v278_v45 = vsel %vm270_vm12, %v276_v38, %v277_v39  ;;  %v257_v46 = vsel %vm247_vm9, %v254_v37, %v256_v28  ;;  %v280_v47 = vsel %vm270_vm12, %v277_v39, %v279_v29  ;;  %725 = vmatpush3.bf16.msra.mxu0 %v724_v15  ;;  %v466_v20 = vld [vmem:[%s1112_s4 + $0x28] sm:$0xff]  ;;  %v471_v29 = vld [vmem:[%s1112_s4 + $0x50] sm:$0xff]  ;;  %v476_v37 = vld [vmem:[%s1112_s4 + $0x78] sm:$0xff] }
 0x18f   :  { %v301_v48 = vsel %vm293_vm8, %v299_v43, %v300_v40  ;;  %v303_v49 = vsel %vm293_vm8, %v300_v40, %v302_v30  ;;  %726 = vmatprep.subr.bf16.mxu0 %v862_v35  ;;  %v730_v22 = vpack.c.bf16 %v466_v20, %v465_v19  ;;  %v733_v25 = vpack.c.bf16 %v468_v24, %v467_v23  ;;  %v472_v30 = vld [vmem:[%s1112_s4 + $0x58] sm:$0xff]  ;;  %v474_v33 = vld [vmem:[%s1112_s4 + $0x68] sm:$0xff]  ;;  %v475_v36 = vld [vmem:[%s1112_s4 + $0x70] sm:$0xff] }
 0x190   :  { %v739_v32 = vpack.c.bf16 %v472_v30, %v471_v29  ;;  %v745_v38 = vpack.c.bf16 %v476_v37, %v475_v36  ;;  %v587_v39 = vld [vmem:[#allocation5] ss:$0 sm:$0xff] }
 0x191   :  { %772 = vrot.lane.b32.xlu0 %v771_v34, %s865_s17  ;;  %239 = vrot.lane.b32.xlu1 %v232_v41, %s864_s1 }
 0x192   :  { %728 = vmatpush3.bf16.msra.mxu0 %v727_v18 }
 0x193   :  { %729 = vmatprep.subr.bf16.mxu0 %v862_v35 }
 0x195   :  { %262 = vrot.lane.b32.xlu0 %v255_v44, %s863_s0  ;;  %285 = vrot.lane.b32.xlu1 %v278_v45, %s865_s17 }
 0x196   :  { %731 = vmatpush3.bf16.msra.mxu0 %v730_v22 }
 0x197   :  { %732 = vmatprep.subr.bf16.mxu0 %v862_v35 }
 0x199   :  { %241 = vrot.lane.b32.xlu0 %v234_v42, %s864_s1  ;;  %264 = vrot.lane.b32.xlu1 %v257_v46, %s863_s0 }
 0x19a   :  { %734 = vmatpush3.bf16.msra.mxu0 %v733_v25 }
 0x19b   :  { %735 = vmatprep.subr.bf16.mxu0 %v862_v35 }
 0x19d   :  { %287 = vrot.lane.b32.xlu0 %v280_v47, %s865_s17 }
 0x1ff   :  { %v768_v50 = vpop.permute.xlu1 %767  ;;  %v763_v51 = vpop.permute.xlu0 %762 }
 0x200   :  { %v764_v52 = vunpack.i.l.bf16 %v763_v51  ;;  %v769_v53 = vunpack.i.l.bf16 %v768_v50  ;;  %v765_v54 = vunpack.i.h.bf16 %v763_v51  ;;  %v770_v59 = vunpack.i.h.bf16 %v768_v50 }
 0x202   :  { %v305_v55 = vsel %vm304_vm10, %v989_v2, %v764_v52  ;;  %v306_v0 = vsel %vm304_vm10, %v983_v60, %v765_v54  ;;  %v340_v52 = vld [vmem:[#allocation5 + $0x8] sm:$0xff] }
 0x203   :  { %v240_v56 = vpop.permute.xlu1 %239  ;;  %v773_v57 = vpop.permute.xlu0 %772  ;;  %v310_v61 = vsel %vm309_vm13, %v305_v55, %v769_v53  ;;  %v311_v2 = vsel %vm309_vm13, %v306_v0, %v770_v59 }
 0x204   :  { %v774_v58 = vunpack.i.l.bf16 %v773_v57  ;;  %v775_v62 = vunpack.i.h.bf16 %v773_v57  ;;  %v307_v4 = vsel %vm304_vm10, %v996_v9, %v240_v56 }
 0x206   :  { %v315_v63 = vsel %vm314_vm14, %v310_v61, %v774_v58  ;;  %v316_v5 = vsel %vm314_vm14, %v311_v2, %v775_v62 }
 0x207   :  { %v263_v1 = vpop.permute.xlu0 %262  ;;  %419 = vmatmul.mubr.f32.vlgmr.msra.gmra.mrb[0].mxu1 %v315_v63  ;;  %v286_v3 = vpop.permute.xlu1 %285 }
 0x208   :  { %589 = vmatprep.mubr.msk.f32.mxu1 %vm304_vm10, %v298_v26  ;;  %v312_v6 = vsel %vm309_vm13, %v307_v4, %v263_v1  ;;  %v469_v26 = vld [vmem:[%s1112_s4 + $0x40] sm:$0xff] }
 0x209   :  { %v317_v10 = vsel %vm314_vm14, %v312_v6, %v286_v3  ;;  %v736_v28 = vpack.c.bf16 %v470_v27, %v469_v26 }
 0x20b   :  { %v242_v7 = vpop.permute.xlu0 %241  ;;  %424 = vmatmul.mubr.f32.gmra.mrb[2].mxu1 %v316_v5  ;;  %v265_v8 = vpop.permute.xlu1 %264  ;;  %737 = vmatpush3.bf16.msra.mxu0 %v736_v28 }
 0x20c   :  { %590 = vmatprep.mubr.msk.f32.mxu1 %vm304_vm10, %v301_v48  ;;  %v308_v60 = vsel %vm304_vm10, %v209_v31, %v242_v7  ;;  %738 = vmatprep.subr.bf16.mxu0 %v862_v35  ;;  %v473_v31 = vld [vmem:[%s1112_s4 + $0x60] sm:$0xff] }
 0x20d   :  { %v313_v12 = vsel %vm309_vm13, %v308_v60, %v265_v8  ;;  %v742_v34 = vpack.c.bf16 %v474_v33, %v473_v31 }
 0x20f   :  { %v288_v11 = vpop.permute.xlu0 %287  ;;  %429 = vmatmul.mubr.f32.gmra.mrb[4].mxu1 %v317_v10  ;;  %740 = vmatpush3.bf16.msra.mxu0 %v739_v32 }
 0x210   :  { %591 = vmatprep.mubr.msk.f32.mxu1 %vm304_vm10, %v303_v49  ;;  %v318_v9 = vsel %vm314_vm14, %v313_v12, %v288_v11  ;;  %741 = vmatprep.subr.bf16.mxu0 %v862_v35  ;;  %v592_v12 = vld [vmem:[%s1112_s4 + $0x80] ss:$0 sm:$0xff] }
 0x213   :  { %434 = vmatmul.mubr.f32.gmra.mrb[6].mxu1 %v318_v9  ;;  %743 = vmatpush3.bf16.msra.mxu0 %v742_v34 }
 0x214   :  { %744 = vmatprep.subr.bf16.mxu0 %v862_v35  ;;  %v341_v35 = vld [vmem:[#allocation5 + $0x10] sm:$0xff] }
 0x217   :  { %746 = vmatpush3.bf16.msra.mxu0 %v745_v38 }
 0x2da   :  { %v420_v40 = vpop.f32.mrb[0].mxu1 }
 0x2db   :  { %v421_v21 = vadd.f32 %v587_v39, %v420_v40  ;;  %v422_v41 = vpop.f32.mrb[1].mxu1 }
 0x2dd   :  { %776 = vtanh.f32 %v421_v21 }
 0x2de   :  { %v425_v42 = vpop.f32.mrb[2].mxu1 }
 0x2df   :  { %v426_v43 = vadd.f32 %v587_v39, %v425_v42  ;;  %v427_v44 = vpop.f32.mrb[3].mxu1 }
 0x2e1   :  { %778 = vtanh.f32 %v426_v43 }
 0x2e2   :  { %v430_v45 = vpop.f32.mrb[4].mxu1 }
 0x2e3   :  { %v431_v46 = vadd.f32 %v587_v39, %v430_v45  ;;  %v432_v47 = vpop.f32.mrb[5].mxu1 }
 0x2e5   :  { %780 = vtanh.f32 %v431_v46 }
 0x2e6   :  { %v435_v48 = vpop.f32.mrb[6].mxu1 }
 0x2e7   :  { %v436_v49 = vadd.f32 %v587_v39, %v435_v48  ;;  %v437_v50 = vpop.f32.mrb[7].mxu1  ;;  %v777_v51 = vpop.eup %776 }
 0x2e8   :  { %v443_v54 = vadd.f32 %v777_v51, %v340_v52 }
 0x2e9   :  { %782 = vtanh.f32 %v436_v49 }
 0x2eb   :  { %v779_v53 = vpop.eup %778 }
 0x2ec   :  { %v444_v55 = vadd.f32 %v779_v53, %v341_v35 }
 0x2ee   :  { %v447_v56 = vmax.f32 %v443_v54, %v444_v55 }
 0x2ef   :  { %v781_v58 = vpop.eup %780 }
 0x2f0   :  { %v448_v57 = vrot.slane %v447_v56, 4  ;;  %v445_v62 = vadd.f32 %v781_v58, %v340_v52 }
 0x2f2   :  { %v449_v59 = vmax.f32 %v447_v56, %v448_v57 }
 0x2f3   :  { %v783_v61 = vpop.eup %782 }
 0x2f4   :  { %v446_v63 = vadd.f32 %v783_v61, %v341_v35  ;;  %v450_v1 = vrot.slane %v449_v59, 2 }
 0x2f6   :  { %v454_v0 = vmax.f32 %v445_v62, %v446_v63  ;;  %v451_v2 = vmax.f32 %v449_v59, %v450_v1 }
 0x2f8   :  { %v455_v3 = vrot.slane %v454_v0, 4  ;;  %v452_v6 = vrot.slane %v451_v2, 1 }
 0x2fa   :  { %v456_v4 = vmax.f32 %v454_v0, %v455_v3  ;;  %v453_v60 = vmax.f32 %v451_v2, %v452_v6 }
 0x2fc   :  { %v457_v5 = vrot.slane %v456_v4, 2 }
 0x2fe   :  { %v458_v7 = vmax.f32 %v456_v4, %v457_v5 }
 0x300   :  { %v459_v8 = vrot.slane %v458_v7, 1 }
 0x302   :  { %v460_v10 = vmax.f32 %v458_v7, %v459_v8 }
 0x304   :  { %v485_v11 = vsel %vm484_vm0, %v460_v10, %v453_v60 }
 0x305   :  { %679 = vmatmul.mubr.f32.vlgmr.msra.gmra.mrb[6].mxu0 %v485_v11 }
 0x3d8   :  { %v553_v9 = vpop.f32.mrb[6].mxu0 }
 0x3d9   :  { %v554_v13 = vadd.f32 %v592_v12, %v553_v9  ;;  %v680_v14 = vpop.f32.mrb[7].mxu0 }
 0x3db   :  { %557 = vst [vmem:[#allocation7] sm:$0x3] %v554_v13 }
 0x3dc   :  { %839 = shalt.err (!%p836_p6)
}
 0x3dd   :  { %s840_s27 = scalar_lea.hbm %s1113_s5, 32 }
 0x3de   :  { %p841_p7 = scmp.ne.s32.totalorder %s1113_s5, %s840_s27  ;;  %p844_p8 = scmp.lt.u32.totalorder %s840_s27, %s1113_s5 }
 0x3e0   :  { %p846_p9 = pnand %p844_p8, %p841_p7 }
 0x3e2   :  { %849 = shalt.err (!%p846_p9)
}
 0x3e3   :  { %567 = dma.vmem_to_hbm [thread:$0]  %s565_s3, 32, %s1113_s5, [#allocation4]  }
 0x3e4   :  { %854 = dma.done.wait [#allocation4], 32  }
 0x3e5   :  { %855 = vsyncadd [#allocation4], 4294967264 }
 0x3e6   :  { %571 = vsyncpa [#allocation3], 1 }
 0x3e7   :  { %572 = vsyncpa [#allocation6], 1 }
 0x3e8   :  { %573 = vsyncpa [#allocation4], 1 }

</bundles_post_ra>
